<compile_context>
chip_gen: v5e
topology: v5e:2x2
jax: 0.10.0
libtpu: 0.0.40
codegen_flags: <defaults>
</compile_context>

<pallas_src>
import functools
from types import SimpleNamespace

import jax
import jax.numpy as jnp
from jax.experimental import pallas as pl
from jax.experimental.pallas import tpu as pltpu

LAMBDA_1 = 0.05  # energy
LAMBDA_2 = 0.75  # forces
LAMBDA_3 = 0.2   # npa charges

_TILE_ROWS = 2048  # (2048, 128) f32 force block = 1 MiB; 2 inputs x 2 buffers = 4 MiB


def _round_up(x, m):
    return ((x + m - 1) // m) * m


def _vmem_capacity_bytes():
    """Generation-aware VMEM capacity; conservative (v7x) fallback if unqueryable."""
    try:
        cap = getattr(pltpu.get_tpu_info(), "vmem_capacity_bytes", None)
        if cap:
            return int(cap)
    except Exception:
        pass
    return 64 << 20  # v7x physical VMEM — safe lower bound for all generations


_VMEM_CAP = _vmem_capacity_bytes()
_SMALL_PATH_BUDGET = (_VMEM_CAP * 3) // 8          # ~24 MiB on v7x, ~48 MiB on v5e/v6e


def _to_slab(x):
    """Lane-dense (rows, 128) slab of x's flat data.

    Copy-free (row-major bitcast reshape) when x.size % 128 == 0; otherwise a
    single zero tail-pad of < 128 elements' worth of alignment is applied
    (|0 - 0| = 0, so the L1 sums stay exact)."""
    flat = jnp.asarray(x).reshape(-1)
    n = flat.shape[0]
    rem = (-n) % 128
    if rem:
        flat = jnp.pad(flat, (0, rem))
    return flat.reshape(-1, 128)


def _slab_vmem_bytes(slab):
    r, c = slab.shape
    return _round_up(max(r, 1), 8) * _round_up(max(c, 1), 128) * max(slab.dtype.itemsize, 4)


def _pack_lanes(vals, shape):
    """Place scalar vals[i] into lane i of a lane-dense f32 tile (one unmasked store)."""
    lane = jax.lax.broadcasted_iota(jnp.int32, shape, len(shape) - 1)
    out = jnp.zeros(shape, jnp.float32)
    for i, v in enumerate(vals):
        out = out + jnp.where(lane == i, v.astype(jnp.float32), jnp.float32(0.0))
    return out


# ----------------------------------------------------------------------------
# Path A: small inputs — single gridless call, full-extent lane-dense slabs.
# ----------------------------------------------------------------------------
def _small_kernel(ep_ref, et_ref, fp_ref, ft_ref, qp_ref, qt_ref, out_ref,
                  *, inv_e, inv_f, inv_q):
    f32 = jnp.float32
    le = jnp.sum(jnp.abs(ep_ref[...].astype(f32) - et_ref[...].astype(f32))) * inv_e
    lf = jnp.sum(jnp.abs(fp_ref[...].astype(f32) - ft_ref[...].astype(f32))) * inv_f
    ln = jnp.sum(jnp.abs(qp_ref[...].astype(f32) - qt_ref[...].astype(f32))) * inv_q
    total = LAMBDA_1 * le + LAMBDA_2 * lf + LAMBDA_3 * ln
    out_ref[...] = _pack_lanes((total, le, lf, ln), out_ref.shape)


def _small_call(ep, et, fp, ft, qp, qt, inv):
    vmem = pl.BlockSpec(memory_space=pltpu.MemorySpace.VMEM)
    limit = int(min(_VMEM_CAP * 3 // 4, _SMALL_PATH_BUDGET + (16 << 20)))
    out = pl.pallas_call(
        functools.partial(_small_kernel, inv_e=inv[0], inv_f=inv[1], inv_q=inv[2]),
        out_shape=jax.ShapeDtypeStruct((1, 128), jnp.float32),
        in_specs=[vmem] * 6,
        out_specs=vmem,
        compiler_params=pltpu.CompilerParams(vmem_limit_bytes=limit),
    )(ep, et, fp, ft, qp, qt)
    return out[0, 0], out[0, 1], out[0, 2], out[0, 3]


# ----------------------------------------------------------------------------
# Path B: large forces — pipelined (TILE_ROWS, 128) row sweep, one-vreg
# accumulator, optional 2-way TensorCore split on the leading parallel axis.
# ----------------------------------------------------------------------------
def _tiled_kernel(ep_ref, et_ref, fp_ref, ft_ref, qp_ref, qt_ref, out_ref, acc_ref,
                  *, bpc, n_blocks, n_rows):
    f32 = jnp.float32
    c = pl.program_id(0)          # core / partial-sum index ("parallel")
    j = pl.program_id(1)          # reduction step along force rows ("arbitrary")
    tr = fp_ref.shape[0]

    @pl.when(j == 0)
    def _init():
        acc_ref[...] = jnp.zeros_like(acc_ref)

    blk = c * bpc + j
    diff = jnp.abs(fp_ref[...].astype(f32) - ft_ref[...].astype(f32))

    # Steady state: straight cross-vreg VALU adds into a single (8,128) vreg.
    @pl.when(blk < n_blocks - 1)
    def _acc_full():
        acc_ref[...] += diff.reshape(tr // 8, 8, 128).sum(axis=0)

    # Only the (possibly ragged) final block pays the row mask; rows past the
    # real slab hold stale VMEM garbage and must be zeroed before accumulation.
    @pl.when(blk == n_blocks - 1)
    def _acc_ragged():
        row = blk * tr + jax.lax.broadcasted_iota(jnp.int32, diff.shape, 0)
        masked = jnp.where(row < n_rows, diff, 0.0)
        acc_ref[...] += masked.reshape(tr // 8, 8, 128).sum(axis=0)

    @pl.when(j == bpc - 1)
    def _finalize():
        fsum = jnp.sum(acc_ref[...])
        esum = jnp.sum(jnp.abs(ep_ref[...].astype(f32) - et_ref[...].astype(f32)))
        qsum = jnp.sum(jnp.abs(qp_ref[...].astype(f32) - qt_ref[...].astype(f32)))
        out_ref[...] = _pack_lanes((fsum, esum, qsum), out_ref.shape)


def _tiled_call(ep, et, fps, fts, qp, qt, inv):
    n_rows = fps.shape[0]
    tr = min(_TILE_ROWS, _round_up(n_rows, 8))
    n_blocks = pl.cdiv(n_rows, tr)
    # 2-way TensorCore split on v7x when the block count divides evenly
    # (index_map stays clamp-free); harmless sequential split on 1-TC chips.
    n_cores = 2 if (n_blocks >= 2 and n_blocks % 2 == 0) else 1
    bpc = n_blocks // n_cores

    def resident(shape):
        return pl.BlockSpec(shape, lambda c, j, _nd=len(shape): (0,) * _nd)

    force_spec = pl.BlockSpec((tr, 128), lambda c, j: (c * bpc + j, 0))

    # TODO(synk): if npa/energy ever rival forces in size, tile them too
    # instead of keeping them resident.
    resident_bytes = sum(_slab_vmem_bytes(a) for a in (ep, et, qp, qt))
    limit = int(min(_VMEM_CAP * 3 // 4,
                    2 * resident_bytes + 4 * tr * 128 * 4 + (8 << 20)))

    out = pl.pallas_call(
        functools.partial(_tiled_kernel, bpc=bpc, n_blocks=n_blocks, n_rows=n_rows),
        out_shape=jax.ShapeDtypeStruct((n_cores * 8, 128), jnp.float32),
        grid=(n_cores, bpc),
        in_specs=[resident(ep.shape), resident(et.shape),
                  force_spec, force_spec,
                  resident(qp.shape), resident(qt.shape)],
        out_specs=pl.BlockSpec((8, 128), lambda c, j: (c, 0)),
        scratch_shapes=[pltpu.VMEM((8, 128), jnp.float32)],
        compiler_params=pltpu.CompilerParams(
            dimension_semantics=("parallel", "arbitrary"),
            vmem_limit_bytes=limit),
    )(ep, et, fps, fts, qp, qt)

    part = out.reshape(n_cores, 8, 128)[:, 0, :]          # (n_cores, 128)
    lf = jnp.sum(part[:, 0]) * inv[1]
    le = part[0, 1] * inv[0]
    ln = part[0, 2] * inv[2]
    total = LAMBDA_1 * le + LAMBDA_2 * lf + LAMBDA_3 * ln
    return total, le, lf, ln


# ----------------------------------------------------------------------------
# Public wrapper (matches the PyTorch module's forward return tuple).
# ----------------------------------------------------------------------------
def energy_force_npa_loss(pred, data):
    """Returns (total_loss, loss_energy, loss_force, loss_npa) as f32 scalars."""
    e_p, e_t = jnp.asarray(pred["energy"]), jnp.asarray(data.energy)
    f_p, f_t = jnp.asarray(pred["forces"]), jnp.asarray(data.energy_grad)
    q_p, q_t = jnp.asarray(pred["npa_charges"]), jnp.asarray(data.npa_charges)
    assert e_p.shape == e_t.shape and f_p.shape == f_t.shape and q_p.shape == q_t.shape

    # Mean reciprocals come from static shapes (multiply in-kernel, never divide).
    inv = (1.0 / e_p.size, 1.0 / f_p.size, 1.0 / q_p.size)

    ep, et = _to_slab(e_p), _to_slab(e_t)
    fp, ft = _to_slab(f_p), _to_slab(f_t)
    qp, qt = _to_slab(q_p), _to_slab(q_t)

    footprint = sum(_slab_vmem_bytes(a) for a in (ep, et, fp, ft, qp, qt))
    if footprint <= _SMALL_PATH_BUDGET:
        return _small_call(ep, et, fp, ft, qp, qt, inv)
    return _tiled_call(ep, et, fp, ft, qp, qt, inv)


if __name__ == "__main__":
    key = jax.random.PRNGKey(0)

    def make_case(k, n_mol, n_atoms):
        ks = jax.random.split(k, 6)
        pred = {
            "energy": jax.random.normal(ks[0], (n_mol, 1), jnp.float32),
            "forces": jax.random.normal(ks[1], (n_atoms, 3), jnp.float32),
            "npa_charges": jax.random.normal(ks[2], (n_atoms,), jnp.float32),
        }
        data = SimpleNamespace(
            energy=jax.random.normal(ks[3], (n_mol, 1), jnp.float32),
            energy_grad=jax.random.normal(ks[4], (n_atoms, 3), jnp.float32),
            npa_charges=jax.random.normal(ks[5], (n_atoms,), jnp.float32),
        )
        return pred, data

    def reference(pred, data):
        le = jnp.mean(jnp.abs(pred["energy"] - data.energy))
        lf = jnp.mean(jnp.abs(pred["forces"] - data.energy_grad))
        ln = jnp.mean(jnp.abs(pred["npa_charges"] - data.npa_charges))
        return LAMBDA_1 * le + LAMBDA_2 * lf + LAMBDA_3 * ln, le, lf, ln

    k_small, k_big = jax.random.split(key)

    # Small shapes consistent with the module (gridless lane-packed path).
    pred_s, data_s = make_case(k_small, n_mol=2, n_atoms=8)
    got = jax.block_until_ready(energy_force_npa_loss(pred_s, data_s))
    want = reference(pred_s, data_s)
    for g, w in zip(got, want):
        assert jnp.allclose(g, w, rtol=1e-5, atol=1e-6), (g, w)

    # Moderate size forced onto the tiled path: 320k atoms -> copy-free
    # 128-aligned slabs, 4 force blocks (even -> 2-way core split exercised),
    # ragged final block (mask path exercised).
    pred_l, data_l = make_case(k_big, n_mol=32, n_atoms=320_000)
    inv_l = (1.0 / pred_l["energy"].size,
             1.0 / pred_l["forces"].size,
             1.0 / pred_l["npa_charges"].size)
    got = jax.block_until_ready(
        _tiled_call(_to_slab(pred_l["energy"]), _to_slab(data_l.energy),
                    _to_slab(pred_l["forces"]), _to_slab(data_l.energy_grad),
                    _to_slab(pred_l["npa_charges"]), _to_slab(data_l.npa_charges),
                    inv_l))
    want = reference(pred_l, data_l)
    for g, w in zip(got, want):
        assert jnp.allclose(g, w, rtol=5e-4, atol=1e-6), (g, w)

    print("KERNEL_OK")
</pallas_src>

<mosaic_0001>
module attributes {stable_mosaic.version = 11 : i64} {
  func.func @_small_kernel(%arg0: memref<1x128xf32, #tpu.memory_space<vmem>>, %arg1: memref<1x128xf32, #tpu.memory_space<vmem>>, %arg2: memref<1x128xf32, #tpu.memory_space<vmem>>, %arg3: memref<1x128xf32, #tpu.memory_space<vmem>>, %arg4: memref<1x128xf32, #tpu.memory_space<vmem>>, %arg5: memref<1x128xf32, #tpu.memory_space<vmem>>, %arg6: memref<1x128xf32, #tpu.memory_space<vmem>>) attributes {dimension_semantics = [], scalar_prefetch = 0 : i64, scratch_operands = 0 : i64, tpu.core_type = #tpu.core_type<tc>} {
    %c0 = arith.constant 0 : index
    %c0_0 = arith.constant 0 : index
    %0 = vector.load %arg0[%c0, %c0_0] : memref<1x128xf32, #tpu.memory_space<vmem>>, vector<1x128xf32>
    %c0_1 = arith.constant 0 : index
    %c0_2 = arith.constant 0 : index
    %1 = vector.load %arg1[%c0_1, %c0_2] : memref<1x128xf32, #tpu.memory_space<vmem>>, vector<1x128xf32>
    %2 = arith.subf %0, %1 : vector<1x128xf32>
    %3 = math.absf %2 : vector<1x128xf32>
    %4 = vector.shape_cast %3 : vector<1x128xf32> to vector<1x1x128xf32>
    %cst = arith.constant dense<0.000000e+00> : vector<1xf32>
    %5 = vector.multi_reduction <add>, %4, %cst [1, 2] : vector<1x1x128xf32> to vector<1xf32>
    %6 = vector.shape_cast %5 : vector<1xf32> to vector<1x1x1xf32>
    %7 = vector.extract %6[0, 0, 0] : f32 from vector<1x1x1xf32>
    %cst_3 = arith.constant 5.000000e-01 : f32
    %8 = arith.mulf %7, %cst_3 : f32
    %c0_4 = arith.constant 0 : index
    %c0_5 = arith.constant 0 : index
    %9 = vector.load %arg2[%c0_4, %c0_5] : memref<1x128xf32, #tpu.memory_space<vmem>>, vector<1x128xf32>
    %c0_6 = arith.constant 0 : index
    %c0_7 = arith.constant 0 : index
    %10 = vector.load %arg3[%c0_6, %c0_7] : memref<1x128xf32, #tpu.memory_space<vmem>>, vector<1x128xf32>
    %11 = arith.subf %9, %10 : vector<1x128xf32>
    %12 = math.absf %11 : vector<1x128xf32>
    %13 = vector.shape_cast %12 : vector<1x128xf32> to vector<1x1x128xf32>
    %cst_8 = arith.constant dense<0.000000e+00> : vector<1xf32>
    %14 = vector.multi_reduction <add>, %13, %cst_8 [1, 2] : vector<1x1x128xf32> to vector<1xf32>
    %15 = vector.shape_cast %14 : vector<1xf32> to vector<1x1x1xf32>
    %16 = vector.extract %15[0, 0, 0] : f32 from vector<1x1x1xf32>
    %cst_9 = arith.constant 0.0416666679 : f32
    %17 = arith.mulf %16, %cst_9 : f32
    %c0_10 = arith.constant 0 : index
    %c0_11 = arith.constant 0 : index
    %18 = vector.load %arg4[%c0_10, %c0_11] : memref<1x128xf32, #tpu.memory_space<vmem>>, vector<1x128xf32>
    %c0_12 = arith.constant 0 : index
    %c0_13 = arith.constant 0 : index
    %19 = vector.load %arg5[%c0_12, %c0_13] : memref<1x128xf32, #tpu.memory_space<vmem>>, vector<1x128xf32>
    %20 = arith.subf %18, %19 : vector<1x128xf32>
    %21 = math.absf %20 : vector<1x128xf32>
    %22 = vector.shape_cast %21 : vector<1x128xf32> to vector<1x1x128xf32>
    %cst_14 = arith.constant dense<0.000000e+00> : vector<1xf32>
    %23 = vector.multi_reduction <add>, %22, %cst_14 [1, 2] : vector<1x1x128xf32> to vector<1xf32>
    %24 = vector.shape_cast %23 : vector<1xf32> to vector<1x1x1xf32>
    %25 = vector.extract %24[0, 0, 0] : f32 from vector<1x1x1xf32>
    %cst_15 = arith.constant 1.250000e-01 : f32
    %26 = arith.mulf %25, %cst_15 : f32
    %cst_16 = arith.constant 5.000000e-02 : f32
    %27 = arith.mulf %cst_16, %8 : f32
    %cst_17 = arith.constant 7.500000e-01 : f32
    %28 = arith.mulf %cst_17, %17 : f32
    %29 = arith.addf %27, %28 : f32
    %cst_18 = arith.constant 2.000000e-01 : f32
    %30 = arith.mulf %cst_18, %26 : f32
    %31 = arith.addf %29, %30 : f32
    %32 = tpu.iota {dimensions = array<i32: 1>} : vector<1x128xi32>
    %cst_19 = arith.constant 0.000000e+00 : f32
    %33 = vector.broadcast %cst_19 : f32 to vector<1x128xf32>
    %c0_i32 = arith.constant 0 : i32
    %34 = vector.broadcast %c0_i32 : i32 to vector<1x128xi32>
    %35 = arith.cmpi eq, %32, %34 : vector<1x128xi32>
    %cst_20 = arith.constant 0.000000e+00 : f32
    %36 = vector.broadcast %31 : f32 to vector<1x128xf32>
    %37 = vector.broadcast %cst_20 : f32 to vector<1x128xf32>
    %38 = arith.select %35, %36, %37 : vector<1x128xi1>, vector<1x128xf32>
    %39 = arith.addf %33, %38 : vector<1x128xf32>
    %c1_i32 = arith.constant 1 : i32
    %40 = vector.broadcast %c1_i32 : i32 to vector<1x128xi32>
    %41 = arith.cmpi eq, %32, %40 : vector<1x128xi32>
    %cst_21 = arith.constant 0.000000e+00 : f32
    %42 = vector.broadcast %8 : f32 to vector<1x128xf32>
    %43 = vector.broadcast %cst_21 : f32 to vector<1x128xf32>
    %44 = arith.select %41, %42, %43 : vector<1x128xi1>, vector<1x128xf32>
    %45 = arith.addf %39, %44 : vector<1x128xf32>
    %c2_i32 = arith.constant 2 : i32
    %46 = vector.broadcast %c2_i32 : i32 to vector<1x128xi32>
    %47 = arith.cmpi eq, %32, %46 : vector<1x128xi32>
    %cst_22 = arith.constant 0.000000e+00 : f32
    %48 = vector.broadcast %17 : f32 to vector<1x128xf32>
    %49 = vector.broadcast %cst_22 : f32 to vector<1x128xf32>
    %50 = arith.select %47, %48, %49 : vector<1x128xi1>, vector<1x128xf32>
    %51 = arith.addf %45, %50 : vector<1x128xf32>
    %c3_i32 = arith.constant 3 : i32
    %52 = vector.broadcast %c3_i32 : i32 to vector<1x128xi32>
    %53 = arith.cmpi eq, %32, %52 : vector<1x128xi32>
    %cst_23 = arith.constant 0.000000e+00 : f32
    %54 = vector.broadcast %26 : f32 to vector<1x128xf32>
    %55 = vector.broadcast %cst_23 : f32 to vector<1x128xf32>
    %56 = arith.select %53, %54, %55 : vector<1x128xi1>, vector<1x128xf32>
    %57 = arith.addf %51, %56 : vector<1x128xf32>
    %c0_24 = arith.constant 0 : index
    %c0_25 = arith.constant 0 : index
    %58 = vector.load %arg6[%c0_24, %c0_25] : memref<1x128xf32, #tpu.memory_space<vmem>>, vector<1x128xf32>
    tpu.vector_store %arg6[%c0_24, %c0_25], %57 {strides = array<i32>} : memref<1x128xf32, #tpu.memory_space<vmem>>, vector<1x128xf32>,
    return
  }
}

</mosaic_0001>

<bundles_post_ra>
// kernel: tpu_custom_call.1
= control target key start
LH: loop header
LB: loop body
LE: loop exit
PB: predicated region body
PF: predicated region fallthrough
CT: control target
= control target key end

     0   :  { %11 = vsyncpa [#allocation3], 0  ;;  %s286_s0 = inlined_call_operand.hbm [shape: f32[1,128], index: 0, kind: input, shape index: {}]   ;;  %s287_s1 = inlined_call_operand.hbm [shape: f32[1,128], index: 1, kind: input, shape index: {}]   ;;  %s288_s2 = inlined_call_operand.vmem [shape: f32[1,128], index: 2, kind: input, shape index: {}]   ;;  %s289_s3 = inlined_call_operand.vmem [shape: f32[1,128], index: 3, kind: input, shape index: {}]   ;;  %s290_s4 = inlined_call_operand.vmem [shape: f32[1,128], index: 4, kind: input, shape index: {}]   ;;  %s291_s5 = inlined_call_operand.vmem [shape: f32[1,128], index: 5, kind: input, shape index: {}]   ;;  %s292_s6 = inlined_call_operand.hbm [shape: f32[1,128], index: 6, kind: output, shape index: {}]  }
   0x1   :  { %12 = vsyncpa [#allocation6], 0 }
   0x2   :  { %13 = vsyncpa [#allocation4], 0  ;;  %s19_s23 = sshll.u32 %s286_s0, 4  ;;  %s227_s24 = smov [#allocation2]   ;;  %s20_s23 = int_to_ptr.hbm [resolvable:$true] %s19_s23 }
   0x3   :  { %s21_s25 = sshll.u32 %s227_s24, 4  ;;  %s30_s28 = sshll.u32 %s287_s1, 4  ;;  %s22_s25 = int_to_ptr.vmem [resolvable:$true] %s21_s25  ;;  %s31_s28 = int_to_ptr.hbm [resolvable:$true] %s30_s28 }
   0x4   :  { %24 = dma.hbm_to_vmem [thread:$0]  %s20_s23, 16, %s22_s25, [#allocation3]  }
   0x5   :  { %s228_s29 = smov [#allocation5]  }
   0x6   :  { %s32_s30 = sshll.u32 %s228_s29, 4  ;;  %s33_s30 = int_to_ptr.vmem [resolvable:$true] %s32_s30 }
   0x7   :  { %35 = dma.hbm_to_vmem [thread:$0]  %s31_s28, 16, %s33_s30, [#allocation6]  }
   0x8   :  { %221 = dma.done.wait [#allocation3], 16  }
   0x9   :  { %222 = vsyncadd [#allocation3], 4294967280 }
   0xa   :  { %223 = dma.done.wait [#allocation6], 16  }
   0xb   :  { %224 = vsyncadd [#allocation6], 4294967280  ;;  %v52_v0 = vld [vmem:[#allocation2] sm:$0x1]  ;;  %v53_v1 = vld [vmem:[#allocation5] sm:$0x1]  ;;  %v103_v36 = vlaneseq }
   0xc   :  { %v83_v2 = vld [vmem:[%s290_s4] sm:$0x1]  ;;  %v54_v3 = vsub.f32 %v52_v0, %v53_v1  ;;  %vm56_vm0 = vcmask 1040384   ;;  %s229_s20 = smov [#allocation7]   ;;  %s129_s24 = sshll.u32 %s292_s6, 4  ;;  %s130_s24 = int_to_ptr.hbm [resolvable:$true] %s129_s24 }
   0xd   :  { %v84_v4 = vld [vmem:[%s291_s5] sm:$0x1]  ;;  %v104_v37 = vand.u32 127, %v103_v36  ;;  %s127_s21 = sshll.u32 %s229_s20, 4  ;;  %s128_s21 = int_to_ptr.vmem [resolvable:$true] %s127_s21 }
   0xe   :  { %v68_v5 = vld [vmem:[%s288_s2] sm:$0x1]  ;;  %v85_v7 = vsub.f32 %v83_v2, %v84_v4  ;;  %v55_v8 = vand.u32 2147483647, %v54_v3 }
   0xf   :  { %v69_v6 = vld [vmem:[%s289_s3] sm:$0x1]  ;;  %vm109_vm1 = vcmp.eq.s32.totalorder %v104_v37, 1  ;;  %vm105_vm2 = vcmp.eq.s32.totalorder %v104_v37, 0  ;;  %vm113_vm3 = vcmp.eq.s32.totalorder %v104_v37, 2  ;;  %vm117_vm4 = vcmp.eq.s32.totalorder %v104_v37, 3 }
  0x10   :  { %v70_v9 = vsub.f32 %v68_v5, %v69_v6  ;;  %v86_v10 = vand.u32 2147483647, %v85_v7  ;;  %v57_v11 = vsel %vm56_vm0, %v55_v8, 0.0 }
  0x11   :  { %58 = vadd.xlane.f32.xlu0 %v57_v11 }
  0x12   :  { %v87_v12 = vsel %vm56_vm0, %v86_v10, 0.0  ;;  %v71_v13 = vand.u32 2147483647, %v70_v9 }
  0x13   :  { %88 = vadd.xlane.f32.xlu1 %v87_v12 }
  0x14   :  { %v72_v14 = vsel %vm56_vm0, %v71_v13, 0.0 }
  0x19   :  { %73 = vadd.xlane.f32.xlu0 %v72_v14 }
  0x84   :  { %v59_v15 = vpop.xlane.xlu0 %58 }
  0x85   :  { %v60_v16 = vrot.slane %v59_v15, 4 }
  0x86   :  { %v89_v17 = vpop.xlane.xlu1 %88 }
  0x87   :  { %v90_v18 = vrot.slane %v89_v17, 4  ;;  %v61_v19 = vadd.f32 %v60_v16, %v59_v15 }
  0x89   :  { %v91_v20 = vadd.f32 %v90_v18, %v89_v17  ;;  %v62_v21 = vrot.slane %v61_v19, 2 }
  0x8b   :  { %v63_v22 = vadd.f32 %v62_v21, %v61_v19  ;;  %v92_v23 = vrot.slane %v91_v20, 2 }
  0x8c   :  { %v74_v24 = vpop.xlane.xlu0 %73 }
  0x8d   :  { %v75_v25 = vrot.slane %v74_v24, 4  ;;  %v64_v26 = vrot.slane %v63_v22, 1  ;;  %v93_v29 = vadd.f32 %v92_v23, %v91_v20 }
  0x8f   :  { %v76_v27 = vadd.f32 %v75_v25, %v74_v24  ;;  %v65_v28 = vadd.f32 %v64_v26, %v63_v22  ;;  %v94_v32 = vrot.slane %v93_v29, 1 }
  0x91   :  { %v77_v30 = vrot.slane %v76_v27, 2  ;;  %140 = vpush %v65_v28  ;;  %v95_v35 = vadd.f32 %v94_v32, %v93_v29 }
  0x93   :  { %v78_v31 = vadd.f32 %v77_v30, %v76_v27 }
  0x95   :  { %v79_v33 = vrot.slane %v78_v31, 1 }
  0x97   :  { %v80_v34 = vadd.f32 %v79_v33, %v78_v31 }
  0x99   :  { %142 = vpush %v80_v34 }
  0x9a   :  { %144 = vpush %v95_v35 }
  0xc2   :  { %s141_s2 = spop %140 }
  0xc3   :  { %s67_s3 = smul.f32 0.5, %s141_s2 }
  0xc5   :  { %s98_s4 = smul.f32 0.05, %s67_s3  ;;  %v110_v38 = vstv %s67_s3 }
  0xc6   :  { %v111_v41 = vsel %vm109_vm1, %v110_v38, 0.0 }
  0xca   :  { %s143_s5 = spop %142 }
  0xcb   :  { %s82_s13 = smul.f32 0.041666668, %s143_s5  ;;  %s145_s14 = spop %144 }
  0xcc   :  { %s97_s15 = smul.f32 0.125, %s145_s14 }
  0xcd   :  { %s99_s16 = smul.f32 0.75, %s82_s13  ;;  %v114_v39 = vstv %s82_s13 }
  0xce   :  { %s101_s18 = smul.f32 0.2, %s97_s15  ;;  %v118_v44 = vstv %s97_s15  ;;  %v115_v45 = vsel %vm113_vm3, %v114_v39, 0.0 }
  0xcf   :  { %s100_s17 = sadd.f32 %s99_s16, %s98_s4  ;;  %v119_v47 = vsel %vm117_vm4, %v118_v44, 0.0 }
  0xd1   :  { %s102_s19 = sadd.f32 %s101_s18, %s100_s17 }
  0xd3   :  { %v106_v40 = vstv %s102_s19 }
  0xd4   :  { %v107_v42 = vsel %vm105_vm2, %v106_v40, 0.0 }
  0xd5   :  { %v112_v43 = vadd.f32 %v111_v41, %v107_v42 }
  0xd7   :  { %v116_v46 = vadd.f32 %v115_v45, %v112_v43 }
  0xd9   :  { %v120_v48 = vadd.f32 %v119_v47, %v116_v46 }
  0xdb   :  { %121 = vst [vmem:[#allocation7] sm:$0x1] %v120_v48 }
  0xdc   :  { %132 = dma.vmem_to_hbm [thread:$0]  %s128_s21, 16, %s130_s24, [#allocation4]  }
  0xdd   :  { %225 = dma.done.wait [#allocation4], 16  }
  0xde   :  { %226 = vsyncadd [#allocation4], 4294967280 }
  0xdf   :  { %137 = vsyncpa [#allocation3], 1 }
  0xe0   :  { %138 = vsyncpa [#allocation6], 1 }
  0xe1   :  { %139 = vsyncpa [#allocation4], 1 }

</bundles_post_ra>
